<compile_context>
chip_gen: v7x
topology: tpu7x:2x2x1
jax: 0.10.0
libtpu: 0.0.40
codegen_flags: <defaults>
</compile_context>

<pallas_src>
import jax
import jax.numpy as jnp
from jax import lax
from jax.experimental import pallas as pl
from jax.experimental.pallas import tpu as pltpu

EPS = 1e-5
_VMEM_LIMIT = 32 * 1024 * 1024  # safe on v5e/v6e (128 MiB) and v7x (64 MiB physical)


def _round_up(a, b):
    return -(-a // b) * b


def _gemm_stats_kernel(p_ref, w_ref, stats_ref):
    """Pass 1 (one M tile): y = P @ W (f32 acc); emit column sum and sum-of-squares."""
    acc = jnp.dot(p_ref[...], w_ref[...], preferred_element_type=jnp.float32)
    s = jnp.sum(acc, axis=0, keepdims=True)           # (1, Np)
    sq = jnp.sum(acc * acc, axis=0, keepdims=True)    # (1, Np)
    stats_ref[...] = jnp.concatenate([s, sq], axis=0)[None]   # (1, 2, Np)


def _gemm_bn_kernel(p_ref, w_ref, scale_ref, shift_ref, o_ref):
    """Pass 2 (one M tile): recompute y = P @ W with the BN scale/shift fused in."""
    acc = jnp.dot(p_ref[...], w_ref[...], preferred_element_type=jnp.float32)
    o_ref[...] = (acc * scale_ref[...] + shift_ref[...]).astype(o_ref.dtype)


def _im2col(x, kh, kw, stride, pad):
    """Extract conv patches; flattened K ordering matches PyTorch (C, kh, kw)."""
    B, C, H, W = x.shape
    xp = jnp.pad(x, ((0, 0), (0, 0), (pad, pad), (pad, pad)))
    Ho = (H + 2 * pad - kh) // stride + 1
    Wo = (W + 2 * pad - kw) // stride + 1
    cols = []
    for di in range(kh):
        for dj in range(kw):
            cols.append(xp[:, :,
                           di:di + (Ho - 1) * stride + 1:stride,
                           dj:dj + (Wo - 1) * stride + 1:stride])
    patches = jnp.stack(cols, axis=2)                     # (B, C, kh*kw, Ho, Wo)
    patches = patches.transpose(0, 3, 4, 1, 2).reshape(B * Ho * Wo, C * kh * kw)
    return patches, Ho, Wo


def overlap_patch_embed(x, params, *, patch_size=7, stride=4, tm=1024,
                        compute_dtype=jnp.bfloat16):
    """Conv2d(patch_size, stride, pad=patch_size//2) -> BatchNorm2d -> (B, L, C), H, W."""
    w = params["w"]
    gamma, beta = params["gamma"], params["beta"]
    # NOTE: params["b"] (conv bias) cancels exactly under training-mode batch norm
    # (it shifts y and its batch mean identically), so it is folded away.
    N = w.shape[0]
    kh = kw = patch_size
    B = x.shape[0]

    # Cast BEFORE im2col so the XLA-side patch build / pad copies are compute_dtype.
    patches, Ho, Wo = _im2col(x.astype(compute_dtype), kh, kw, stride, patch_size // 2)
    M, K = patches.shape

    Np = _round_up(N, 128)     # lane-dense output columns
    Kp = _round_up(K, 16)      # sublane requirement only (no 128 pad -> fewer HBM bytes)

    # Tile M; keep at least two tiles when M permits so the "parallel" axis
    # actually feeds both TensorCores on v7x.
    tm = _round_up(min(tm, M), 16)
    if M > 16:
        tm = min(tm, _round_up(-(-M // 2), 16))
    Mp = _round_up(M, tm)
    n_tiles = Mp // tm

    # Padded M rows are exactly zero -> per-tile stats remain correct (divide by true M).
    patches = jnp.pad(patches, ((0, Mp - M), (0, Kp - K)))
    w_mat = jnp.pad(w.reshape(N, K).T.astype(compute_dtype),
                    ((0, Kp - K), (0, Np - N)))

    # ---- pass 1: M-tiled GEMM emitting only per-tile column statistics ----
    stats = pl.pallas_call(
        _gemm_stats_kernel,
        out_shape=jax.ShapeDtypeStruct((n_tiles, 2, Np), jnp.float32),
        grid_spec=pltpu.PrefetchScalarGridSpec(
            num_scalar_prefetch=0,
            grid=(n_tiles,),
            in_specs=[
                pl.BlockSpec((tm, Kp), lambda i: (i, 0)),   # patches M tile, full K
                pl.BlockSpec((Kp, Np), lambda i: (0, 0)),   # full weight, resident
            ],
            out_specs=pl.BlockSpec((1, 2, Np), lambda i: (i, 0, 0)),  # [sum; sumsq]
        ),
        compiler_params=pltpu.CompilerParams(
            dimension_semantics=("parallel",),
            vmem_limit_bytes=_VMEM_LIMIT),
    )(patches, w_mat)

    # ---- finalize batch statistics in f32 ----
    mean = stats[:, 0, :].sum(axis=0) / M
    ex2 = stats[:, 1, :].sum(axis=0) / M
    # TODO(synk): E[x^2]-mean^2 can cancel for activations with a large DC offset;
    # Welford-style centered partials would be more robust. The clamp prevents NaN.
    var = jnp.maximum(ex2 - mean * mean, 0.0)
    gamma_p = jnp.pad(gamma, (0, Np - N))
    beta_p = jnp.pad(beta, (0, Np - N))
    scale = gamma_p * lax.rsqrt(var + EPS)
    shift = beta_p - mean * scale

    # ---- pass 2: recompute the tile GEMM with the BN scale/shift fused epilogue ----
    out = pl.pallas_call(
        _gemm_bn_kernel,
        out_shape=jax.ShapeDtypeStruct((Mp, Np), x.dtype),
        grid_spec=pltpu.PrefetchScalarGridSpec(
            num_scalar_prefetch=0,
            grid=(n_tiles,),
            in_specs=[
                pl.BlockSpec((tm, Kp), lambda i: (i, 0)),
                pl.BlockSpec((Kp, Np), lambda i: (0, 0)),
                pl.BlockSpec((1, Np), lambda i: (0, 0)),
                pl.BlockSpec((1, Np), lambda i: (0, 0)),
            ],
            out_specs=pl.BlockSpec((tm, Np), lambda i: (i, 0)),
        ),
        compiler_params=pltpu.CompilerParams(
            dimension_semantics=("parallel",),
            vmem_limit_bytes=_VMEM_LIMIT),
    )(patches, w_mat, scale.reshape(1, Np), shift.reshape(1, Np))

    if Mp != M or Np != N:
        out = out[:M, :N]
    out = out.reshape(B, Ho * Wo, N)
    return out, Ho, Wo


def reference(x, params, *, patch_size=7, stride=4):
    """Pure-JAX reference mirroring the PyTorch forward (training-mode BN)."""
    w, b = params["w"], params["b"]
    gamma, beta = params["gamma"], params["beta"]
    pad = patch_size // 2
    y = lax.conv_general_dilated(
        x, w, window_strides=(stride, stride),
        padding=((pad, pad), (pad, pad)),
        dimension_numbers=("NCHW", "OIHW", "NCHW"))
    y = y + b[None, :, None, None]
    mean = jnp.mean(y, axis=(0, 2, 3), keepdims=True)
    var = jnp.mean((y - mean) ** 2, axis=(0, 2, 3), keepdims=True)
    y = (y - mean) / jnp.sqrt(var + EPS)
    y = y * gamma[None, :, None, None] + beta[None, :, None, None]
    B, C, H, W = y.shape
    return y.reshape(B, C, H * W).transpose(0, 2, 1), H, W


if __name__ == "__main__":
    B, C_in, H, W = 2, 4, 16, 16
    embed_dim, patch_size, stride = 32, 7, 4

    key = jax.random.PRNGKey(0)
    k1, k2, k3, k4, k5 = jax.random.split(key, 5)
    x = jax.random.normal(k1, (B, C_in, H, W), jnp.float32)
    params = {
        "w": 0.1 * jax.random.normal(
            k2, (embed_dim, C_in, patch_size, patch_size), jnp.float32),
        "b": 0.1 * jax.random.normal(k3, (embed_dim,), jnp.float32),
        "gamma": 1.0 + 0.1 * jax.random.normal(k4, (embed_dim,), jnp.float32),
        "beta": 0.1 * jax.random.normal(k5, (embed_dim,), jnp.float32),
    }

    ref, Hr, Wr = reference(x, params, patch_size=patch_size, stride=stride)

    # f32 path: tight tolerance against the f32 reference (GEMM recompute keeps f32).
    out32, Ho, Wo = overlap_patch_embed(
        x, params, patch_size=patch_size, stride=stride, compute_dtype=jnp.float32)
    out32 = jax.block_until_ready(out32)
    assert (Ho, Wo) == (Hr, Wr), (Ho, Wo, Hr, Wr)
    assert out32.shape == (B, Ho * Wo, embed_dim), out32.shape
    assert jnp.allclose(out32, ref, atol=1e-4, rtol=1e-4), \
        float(jnp.abs(out32 - ref).max())

    # bf16 GEMM path (f32 accumulation / stats): bf16-appropriate tolerance.
    outbf, Ho2, Wo2 = overlap_patch_embed(
        x, params, patch_size=patch_size, stride=stride, compute_dtype=jnp.bfloat16)
    outbf = jax.block_until_ready(outbf)
    assert (Ho2, Wo2) == (Hr, Wr)
    assert jnp.allclose(outbf, ref, atol=5e-2, rtol=5e-2), \
        float(jnp.abs(outbf - ref).max())

    print("KERNEL_OK")
</pallas_src>

<mosaic_0001>
module attributes {stable_mosaic.version = 11 : i64} {
  func.func @_gemm_stats_kernel(%arg0: i32, %arg1: memref<16x208xf32, #tpu.memory_space<vmem>>, %arg2: memref<208x128xf32, #tpu.memory_space<vmem>>, %arg3: memref<1x2x128xf32, #tpu.memory_space<vmem>>) attributes {dimension_semantics = [#tpu.dimension_semantics<parallel>], iteration_bounds = array<i64: 2>, scalar_prefetch = 0 : i64, scratch_operands = 0 : i64, tpu.core_type = #tpu.core_type<tc>, window_params = [{transform_indices = @transform_0, window_bounds = array<i64: 16, 208>}, {pipeline_mode = #tpu.pipeline_mode<synchronous>, transform_indices = @transform_1, window_bounds = array<i64: 208, 128>}, {transform_indices = @transform_2, window_bounds = array<i64: 1, 2, 128>}]} {
    %c0 = arith.constant 0 : index
    %c0_0 = arith.constant 0 : index
    %0 = vector.load %arg1[%c0, %c0_0] : memref<16x208xf32, #tpu.memory_space<vmem>>, vector<16x208xf32>
    %c0_1 = arith.constant 0 : index
    %c0_2 = arith.constant 0 : index
    %1 = vector.load %arg2[%c0_1, %c0_2] : memref<208x128xf32, #tpu.memory_space<vmem>>, vector<208x128xf32>
    %cst = arith.constant dense<0.000000e+00> : vector<16x128xf32>
    %2 = tpu.matmul %0, %1, %cst {dimension_numbers = #tpu.dot_dimension_numbers<[1], [0], [0], [1], [0, 0, 1, 1], [], []>} : vector<16x208xf32>, vector<208x128xf32>, vector<16x128xf32> -> vector<16x128xf32>
    %cst_3 = arith.constant dense<0.000000e+00> : vector<128xf32>
    %3 = vector.multi_reduction <add>, %2, %cst_3 [0] : vector<16x128xf32> to vector<128xf32>
    %4 = vector.shape_cast %3 : vector<128xf32> to vector<1x128xf32>
    %5 = arith.mulf %2, %2 : vector<16x128xf32>
    %cst_4 = arith.constant dense<0.000000e+00> : vector<128xf32>
    %6 = vector.multi_reduction <add>, %5, %cst_4 [0] : vector<16x128xf32> to vector<128xf32>
    %7 = vector.shape_cast %6 : vector<128xf32> to vector<1x128xf32>
    %8 = tpu.concatenate %4, %7 in 0 : vector<1x128xf32>, vector<1x128xf32> -> vector<2x128xf32>
    %9 = vector.shape_cast %8 : vector<2x128xf32> to vector<1x2x128xf32>
    %c0_5 = arith.constant 0 : index
    %c0_6 = arith.constant 0 : index
    %c0_7 = arith.constant 0 : index
    %10 = vector.load %arg3[%c0_5, %c0_6, %c0_7] : memref<1x2x128xf32, #tpu.memory_space<vmem>>, vector<1x2x128xf32>
    tpu.vector_store %arg3[%c0_5, %c0_6, %c0_7], %9 {strides = array<i32>} : memref<1x2x128xf32, #tpu.memory_space<vmem>>, vector<1x2x128xf32>,
    return
  }
  func.func @transform_0(%arg0: i32) -> (i32, i32) {
    %c0_i32 = arith.constant 0 : i32
    %c0_i32_0 = arith.constant 0 : i32
    return %arg0, %c0_i32 : i32, i32
  }
  func.func @transform_1(%arg0: i32) -> (i32, i32) {
    %c0_i32 = arith.constant 0 : i32
    %c0_i32_0 = arith.constant 0 : i32
    %c0_i32_1 = arith.constant 0 : i32
    return %c0_i32, %c0_i32_0 : i32, i32
  }
  func.func @transform_2(%arg0: i32) -> (i32, i32, i32) {
    %c0_i32 = arith.constant 0 : i32
    %c0_i32_0 = arith.constant 0 : i32
    %c0_i32_1 = arith.constant 0 : i32
    return %arg0, %c0_i32, %c0_i32_0 : i32, i32, i32
  }
}

</mosaic_0001>

<bundles_post_ra>
// kernel: tpu_custom_call.1
= control target key start
LH: loop header
LB: loop body
LE: loop exit
PB: predicated region body
PF: predicated region fallthrough
CT: control target
= control target key end

     0   :  { %7 = vsyncpa [#allocation3], 0  ;;  %s936_s0 = inlined_call_operand.hbm [shape: f32[32,208], index: 0, kind: input, shape index: {}]   ;;  %s937_s1 = inlined_call_operand.hbm [shape: f32[208,128], index: 1, kind: input, shape index: {}]   ;;  %s938_s2 = inlined_call_operand.hbm [shape: f32[2,2,128], index: 2, kind: output, shape index: {}]  }
   0x1   :  { %9 = vsyncpa [#allocation3 + $0x1], 0 }
   0x2   :  { %10 = vsyncpa [#allocation6], 0 }
   0x3   :  { %11 = vsyncpa [#allocation4], 0 }
   0x4   :  { %13 = vsyncpa [#allocation4 + $0x1], 0  ;;  %s704_s9 = smov 0   ;;  %s706_s10 = smov 0  }
   0x5   :  { %s708_s11 = smov 0   ;;  %s710_s12 = smov 0  }
   0x6 LB: > { %s725_s13 = sadd.s32 4294967295, %s679_s12   ;;  %s404_s14 = sadd.s32 4294967294, %s679_s12   ;;  %s679_s12 = sphi %s710_s12, %s958_s12   ;;  %s675_s11 = sphi %s708_s11, %s957_s11   ;;  %s671_s10 = sphi %s706_s10, %s956_s10   ;;  %s667_s9 = sphi %s704_s9, %s955_s9  }
   0x7   : > { %p39_p0 = scmp.ne.s32.totalorder %s671_s10, %s667_s9  ;;  %p939_p1 = scmp.eq.s32.totalorder %s725_s13, 0 }
   0x8   : > { %p90_p3 = scmp.eq.s32.totalorder %s404_s14, 1  ;;  %p405_p5 = scmp.ge.s32.totalorder %s679_s12, 1 }
   0x9   : > { %p734_p4 = por %p939_p1, %p39_p0  ;;  %p97_p7 = scmp.lt.s32.totalorder %s679_s12, 3 }
   0xa   : > { %p739_p6 = por %p90_p3, %p39_p0  ;;  %s681_s18 = smov [#allocation5]  }
   0xb   : > { %s942_s15 = scalar_select %p734_p4, 1, 0 }
   0xc   : > { %s943_s16 = scalar_select %p739_p6, 1, 0 }
   0xd   : > { %p744_p8 = pnand %p405_p5, %p97_p7  ;;  %s109_s19 = sshll.u32 %s681_s18, 4  ;;  %s748_s19 = int_to_ptr.vmem [resolvable:$true] %s109_s19 }
   0xe   : > { %s760_s21 = sadd.s32 1, %s679_s12   ;;  %s26_s22 = sadd.s32 1, %s675_s11 }
   0xf   : > { %s944_s17 = scalar_select %p744_p8, 1, 0 }
  0x10   : > { %p497_p9 = pneg %p744_p8  ;;  %s23_s23 = ssub.s32 %s679_s12, %s760_s21 }
  0x11   : > { %s551_s26 = scalar_lea.hbm %s937_s1, 3328 }
  0x12   : > { %p755_p11 = pnand %p497_p9, %p939_p1  ;;  %p552_p12 = scmp.ne.s32.totalorder %s937_s1, %s551_s26 }
  0x13   : > { %p558_p5 = scmp.lt.u32.totalorder %s551_s26, %s937_s1 }
  0x14   : > { %p553_p13 = pneg %p755_p11 }
  0x16   : > { %p554_p0 = pnand %p553_p13, %p552_p12 }
  0x18   : > { %p555_p3 = pneg %p554_p0 }
  0x1a   : > { %p560_p7 = pnand %p558_p5, %p555_p3 }
  0x1c   : > { %563 = shalt.err (!%p560_p7)
}
  0x1d   : > { %s564_s3 = scalar_lea.vmem %s748_s19, 3328  ;;  %p572_p2 = scmp.lt.s32.totalorder %s748_s19, %s748_s19 }
  0x1e   : > { %p565_p9 = scmp.ne.s32.totalorder %s748_s19, %s564_s3  ;;  %p573_p6 = scmp.lt.s32.totalorder %s564_s3, %s564_s3 }
  0x20   : > { %p567_p10 = pnand %p565_p9, %p553_p13  ;;  %p574_p4 = por %p573_p6, %p572_p2 }
  0x22   : > { %p568_p1 = pneg %p567_p10 }
  0x24   : > { %p575_p8 = pnand %p574_p4, %p568_p1 }
  0x26   : > { %578 = shalt.err (!%p575_p8)
}
  0x27   : > { %s682_s4 = smov 128   ;;  %s683_s5 = smov 8  }
  0x28   : > { %500 = dma.hbm_to_vmem [thread:$0]  (!%p755_p11), %s937_s1, 3328, %s748_s19, [#allocation6], %s682_s4, %s682_s4, %s683_s5  }
  0x29   : > { %p24_p2 = scmp.eq.s32.totalorder %s23_s23, 0  ;;  %p33_p1 = scmp.ne.s32.totalorder %s675_s11, %s671_s10 }
  0x2a   : > { %p34_p4 = scmp.eq.s32.totalorder %s679_s12, 0  ;;  %p510_p6 = scmp.lt.s32.totalorder %s679_s12, 2 }
  0x2b   : > { %s791_s8 = scalar_select %p24_p2, %s675_s11, %s26_s22  }
  0x2c   : > { %p35_p8 = por %p34_p4, %p33_p1  ;;  %p946_p10 = scmp.eq.s32.totalorder %s725_s13, 1 }
  0x2d   : > { %s123_s18 = sand.u32 1, %s675_s11   ;;  %s423_s24 = sshll.u32 %s679_s12, 9 }
  0x2e   : > { %p795_p12 = por %p946_p10, %p33_p1  ;;  %s408_s25 = sshll.u32 %s123_s18, 5 }
  0x2f   : > { %s804_s27 = scalar_lea.hbm %s936_s0, %s423_s24  ;;  %s127_s19 = scalar_lea.vmem [#allocation2], %s408_s25 }
  0x30   : > { %s135_s22 = sshll.u32 %s127_s19, 4  ;;  %p806_p11 = pnand %p510_p6, %p35_p8  ;;  %s810_s22 = int_to_ptr.vmem [resolvable:$true] %s135_s22 }
  0x31   : > { %s812_s28 = scalar_lea.sflag [#allocation3], %s123_s18  ;;  %s579_s29 = scalar_lea.hbm %s804_s27, 512 }
  0x32   : > { %p580_p13 = scmp.ne.s32.totalorder %s804_s27, %s579_s29  ;;  %p581_p0 = pneg %p806_p11 }
  0x33   : > { %s584_s4 = scalar_lea.hbm %s936_s0, 1024  ;;  %p585_p7 = scmp.lt.u32.totalorder %s804_s27, %s936_s0 }
  0x34   : > { %p582_p3 = pnand %p581_p0, %p580_p13  ;;  %p586_p9 = scmp.lt.u32.totalorder %s584_s4, %s579_s29 }
  0x35   : > { %p588_p1 = scmp.lt.u32.totalorder %s579_s29, %s804_s27 }
  0x36   : > { %p583_p5 = pneg %p582_p3  ;;  %p587_p2 = por %p586_p9, %p585_p7 }
  0x38   : > { %p589_p4 = por %p588_p1, %p587_p2 }
  0x3a   : > { %p590_p6 = pnand %p589_p4, %p583_p5 }
  0x3c   : > { %593 = shalt.err (!%p590_p6)
}
  0x3d   : > { %s594_s7 = scalar_lea.vmem %s810_s22, 512  ;;  %s684_s18 = smov [#allocation2]  }
  0x3e   : > { %p595_p8 = scmp.ne.s32.totalorder %s810_s22, %s594_s7  ;;  %s599_s24 = sshll.u32 %s684_s18, 4  ;;  %s600_s24 = int_to_ptr.vmem [resolvable:$false] %s599_s24 }
  0x3f   : > { %s601_s25 = scalar_lea.vmem %s600_s24, 1024  ;;  %p602_p3 = scmp.lt.s32.totalorder %s810_s22, %s600_s24 }
  0x40   : > { %p597_p10 = pnand %p595_p8, %p581_p0  ;;  %p603_p7 = scmp.lt.s32.totalorder %s601_s25, %s594_s7 }
  0x42   : > { %p598_p13 = pneg %p597_p10  ;;  %p604_p9 = por %p603_p7, %p602_p3 }
  0x44   : > { %p605_p2 = pnand %p604_p9, %p598_p13 }
  0x46   : > { %608 = shalt.err (!%p605_p2)
}
  0x47   : > { %s685_s20 = smov 256   ;;  %s686_s26 = smov 16  }
  0x48   : > { %504 = dma.hbm_to_vmem [thread:$0]  (!%p806_p11), %s804_s27, 512, %s810_s22, %s812_s28, %s685_s20, %s685_s20, %s686_s26  }
  0x49   : > { %p949_p0 = scmp.ne.s32.totalorder %s944_s17, 0 }
  0x4a   : > { %s843_s19 = sand.u32 (!%p949_p0), 1, %s671_s10   ;;  %p950_p5 = scmp.ne.s32.totalorder (!%p949_p0), %s942_s15, 0 }
  0x4b   : > { %147 = sbr.rel (%p949_p0) target bundleno = 383 (0x17f), region = 28  ;;  %s413_s29 = sshll.u32 (!%p949_p0), %s843_s19, 5 }
  0x4c   : > { %s150_s30 = scalar_lea.sflag (!%p949_p0), [#allocation3], %s843_s19  ;;  %s847_s3 = scalar_lea.vmem (!%p949_p0), [#allocation2], %s413_s29 }
  0x52   : > { %654 = dma.done.wait (%p950_p5), %s150_s30, 512  }
  0x53   : > { %656 = vsyncadd (%p950_p5), %s150_s30, 4294966784  ;;  %p951_p11 = scmp.eq.s32.totalorder %s725_s13, 0 }
  0x55   : > { %658 = dma.done.wait (%p951_p11), [#allocation6], 3328   ;;  %p952_p1 = pmov %p951_p11 }
  0x56   : > { %v687_v0 = vmov 0.0|0.0   ;;  %v183_v1 = vld [vmem:[#allocation5] sm:$0xff]  ;;  %v184_v2 = vld [vmem:[#allocation5 + $0x8] sm:$0xff]  ;;  %v185_v3 = vld [vmem:[#allocation5 + $0x10] sm:$0xff]  ;;  %vm209_vm0 = vcmask 654336   ;;  %s415_s15 = sshll.u32 %s843_s19, 1 }
  0x57   : > { %660 = vsyncadd (%p952_p1), [#allocation6], 4294963968  ;;  %424 = vmatprep.subr.bf16.mxu0 %v687_v0  ;;  %463 = vmatprep.subr.bf16.mxu1 %v687_v0  ;;  %v425_v4 = vpack.c.bf16 %v184_v2, %v183_v1  ;;  %v186_v5 = vld [vmem:[#allocation5 + $0x18] sm:$0xff]  ;;  %v187_v7 = vld [vmem:[#allocation5 + $0x20] sm:$0xff]  ;;  %s419_s17 = sshll.u32 %s725_s13, 5  ;;  %s177_s27 = scalar_lea.vmem [#allocation7], %s415_s15 }
  0x58   : > { %v428_v6 = vpack.c.bf16 %v186_v5, %v185_v3  ;;  %v188_v8 = vld [vmem:[#allocation5 + $0x28] sm:$0xff]  ;;  %v189_v10 = vld [vmem:[#allocation5 + $0x30] sm:$0xff]  ;;  %v190_v11 = vld [vmem:[#allocation5 + $0x38] sm:$0xff]  ;;  %s324_s22 = sshll.u32 %s177_s27, 4  ;;  %vm307_vm1 = vcmask 1040384   ;;  %s892_s4 = scalar_lea.hbm %s938_s2, %s419_s17  ;;  %s894_s22 = int_to_ptr.vmem [resolvable:$true] %s324_s22 }
  0x59   : > { %426 = vmatpush1.bf16.msra.mxu0 %v425_v4  ;;  %476 = vmatpush1.bf16.msra.mxu1 %v425_v4  ;;  %v431_v9 = vpack.c.bf16 %v188_v8, %v187_v7  ;;  %v180_v12 = vld [vmem:[%s847_s3 + $0x8] sm:$0xff]  ;;  %v182_v13 = vld [vmem:[%s847_s3 + $0x18] sm:$0xff]  ;;  %v434_v14 = vpack.c.bf16 %v190_v11, %v189_v10  ;;  %v191_v15 = vld [vmem:[#allocation5 + $0x40] sm:$0xff]  ;;  %s311_s5 = scalar_lea.sflag [#allocation4], %s843_s19  ;;  %s609_s6 = scalar_lea.vmem %s894_s22, 32 }
  0x5a   : > { %427 = vmatprep.subr.bf16.mxu0 %v687_v0  ;;  %464 = vmatprep.subr.bf16.mxu1 %v687_v0  ;;  %v192_v16 = vld [vmem:[#allocation5 + $0x48] sm:$0xff]  ;;  %v193_v18 = vld [vmem:[#allocation5 + $0x50] sm:$0xff]  ;;  %v194_v19 = vld [vmem:[#allocation5 + $0x58] sm:$0xff]  ;;  %p610_p4 = scmp.ne.s32.totalorder %s894_s22, %s609_s6  ;;  %s688_s13 = smov [#allocation7]  }
  0x5b   : > { %416 = vmatprep.mubr.msk.f32.mxu0 %vm209_vm0, %v180_v12  ;;  %417 = vmatprep.mubr.msk.f32.mxu1 %vm209_vm0, %v182_v13  ;;  %v437_v17 = vpack.c.bf16 %v192_v16, %v191_v15  ;;  %v440_v20 = vpack.c.bf16 %v194_v19, %v193_v18  ;;  %v195_v21 = vld [vmem:[#allocation5 + $0x60] sm:$0xff]  ;;  %v196_v22 = vld [vmem:[#allocation5 + $0x68] sm:$0xff]  ;;  %v197_v24 = vld [vmem:[#allocation5 + $0x70] sm:$0xff]  ;;  %s613_s7 = sshll.u32 %s688_s13, 4  ;;  %s614_s7 = int_to_ptr.vmem [resolvable:$false] %s613_s7 }
  0x5c   : > { %v443_v23 = vpack.c.bf16 %v196_v22, %v195_v21  ;;  %v198_v25 = vld [vmem:[#allocation5 + $0x78] sm:$0xff]  ;;  %v199_v27 = vld [vmem:[#allocation5 + $0x80] sm:$0xff]  ;;  %v200_v28 = vld [vmem:[#allocation5 + $0x88] sm:$0xff]  ;;  %p611_p6 = pnand %p610_p4, %p795_p12  ;;  %s615_s18 = scalar_lea.vmem %s614_s7, 64 }
  0x5d   : > { %429 = vmatpush1.bf16.msra.mxu0 %v428_v6  ;;  %477 = vmatpush1.bf16.msra.mxu1 %v428_v6  ;;  %v446_v26 = vpack.c.bf16 %v198_v25, %v197_v24  ;;  %v449_v29 = vpack.c.bf16 %v200_v28, %v199_v27  ;;  %v201_v30 = vld [vmem:[#allocation5 + $0x90] sm:$0xff]  ;;  %v202_v31 = vld [vmem:[#allocation5 + $0x98] sm:$0xff]  ;;  %v203_v33 = vld [vmem:[#allocation5 + $0xa0] sm:$0xff]  ;;  %p616_p10 = scmp.lt.s32.totalorder %s894_s22, %s614_s7  ;;  %p617_p13 = scmp.lt.s32.totalorder %s615_s18, %s609_s6 }
  0x5e   : > { %430 = vmatprep.subr.bf16.mxu0 %v687_v0  ;;  %465 = vmatprep.subr.bf16.mxu1 %v687_v0  ;;  %v452_v32 = vpack.c.bf16 %v202_v31, %v201_v30  ;;  %v204_v34 = vld [vmem:[#allocation5 + $0xa8] sm:$0xff]  ;;  %v205_v36 = vld [vmem:[#allocation5 + $0xb0] sm:$0xff]  ;;  %v206_v37 = vld [vmem:[#allocation5 + $0xb8] sm:$0xff]  ;;  %p612_p8 = pneg %p611_p6 }
  0x5f   : > { %v455_v35 = vpack.c.bf16 %v204_v34, %v203_v33  ;;  %v458_v38 = vpack.c.bf16 %v206_v37, %v205_v36  ;;  %v207_v39 = vld [vmem:[#allocation5 + $0xc0] sm:$0xff]  ;;  %v208_v40 = vld [vmem:[#allocation5 + $0xc8] sm:$0xff]  ;;  %v181_v43 = vld [vmem:[%s847_s3 + $0x10] sm:$0xff]  ;;  %p618_p3 = por %p617_p13, %p616_p10 }
  0x60   : > { %v461_v41 = vpack.c.bf16 %v208_v40, %v207_v39  ;;  %v179_v42 = vld [vmem:[%s847_s3] sm:$0xff] }
  0x61   : > { %432 = vmatpush1.bf16.msra.mxu0 %v431_v9  ;;  %478 = vmatpush1.bf16.msra.mxu1 %v431_v9  ;;  %p619_p7 = pnand %p618_p3, %p612_p8 }
  0x62   : > { %433 = vmatprep.subr.bf16.mxu0 %v687_v0  ;;  %466 = vmatprep.subr.bf16.mxu1 %v687_v0 }
  0x65   : > { %435 = vmatpush1.bf16.msra.mxu0 %v434_v14  ;;  %479 = vmatpush1.bf16.msra.mxu1 %v434_v14 }
  0x66   : > { %436 = vmatprep.subr.bf16.mxu0 %v687_v0  ;;  %467 = vmatprep.subr.bf16.mxu1 %v687_v0 }
  0x69   : > { %438 = vmatpush1.bf16.msra.mxu0 %v437_v17  ;;  %480 = vmatpush1.bf16.msra.mxu1 %v437_v17 }
  0x6a   : > { %439 = vmatprep.subr.bf16.mxu0 %v687_v0  ;;  %468 = vmatprep.subr.bf16.mxu1 %v687_v0 }
  0x6d   : > { %441 = vmatpush1.bf16.msra.mxu0 %v440_v20  ;;  %481 = vmatpush1.bf16.msra.mxu1 %v440_v20 }
  0x6e   : > { %442 = vmatprep.subr.bf16.mxu0 %v687_v0  ;;  %469 = vmatprep.subr.bf16.mxu1 %v687_v0 }
  0x71   : > { %444 = vmatpush1.bf16.msra.mxu0 %v443_v23  ;;  %482 = vmatpush1.bf16.msra.mxu1 %v443_v23 }
  0x72   : > { %445 = vmatprep.subr.bf16.mxu0 %v687_v0  ;;  %470 = vmatprep.subr.bf16.mxu1 %v687_v0 }
  0x75   : > { %447 = vmatpush1.bf16.msra.mxu0 %v446_v26  ;;  %483 = vmatpush1.bf16.msra.mxu1 %v446_v26 }
  0x76   : > { %448 = vmatprep.subr.bf16.mxu0 %v687_v0  ;;  %471 = vmatprep.subr.bf16.mxu1 %v687_v0 }
  0x79   : > { %450 = vmatpush1.bf16.msra.mxu0 %v449_v29  ;;  %484 = vmatpush1.bf16.msra.mxu1 %v449_v29 }
  0x7a   : > { %451 = vmatprep.subr.bf16.mxu0 %v687_v0  ;;  %472 = vmatprep.subr.bf16.mxu1 %v687_v0 }
  0x7d   : > { %453 = vmatpush1.bf16.msra.mxu0 %v452_v32  ;;  %485 = vmatpush1.bf16.msra.mxu1 %v452_v32 }
  0x7e   : > { %454 = vmatprep.subr.bf16.mxu0 %v687_v0  ;;  %473 = vmatprep.subr.bf16.mxu1 %v687_v0 }
  0x81   : > { %456 = vmatpush1.bf16.msra.mxu0 %v455_v35  ;;  %486 = vmatpush1.bf16.msra.mxu1 %v455_v35 }
  0x82   : > { %457 = vmatprep.subr.bf16.mxu0 %v687_v0  ;;  %474 = vmatprep.subr.bf16.mxu1 %v687_v0 }
  0x85   : > { %459 = vmatpush1.bf16.msra.mxu0 %v458_v38  ;;  %487 = vmatpush1.bf16.msra.mxu1 %v458_v38 }
  0x86   : > { %460 = vmatprep.subr.bf16.mxu0 %v687_v0  ;;  %475 = vmatprep.subr.bf16.mxu1 %v687_v0 }
  0x89   : > { %462 = vmatpush1.bf16.msra.mxu0 %v461_v41  ;;  %488 = vmatpush1.bf16.msra.mxu1 %v461_v41 }
  0x8c   : > { %281 = vmatmul.mubr.f32.vlgmr.msra.gmra.mrb[0].mxu0 %v179_v42  ;;  %286 = vmatmul.mubr.f32.vlgmr.msra.gmra.mrb[0].mxu1 %v181_v43 }
 0x15f   : > { %v282_v44 = vpop.f32.mrb[0].mxu0  ;;  %v287_v45 = vpop.f32.mrb[0].mxu1 }
 0x160   : > { %v298_v46 = vmul.f32 %v282_v44, %v282_v44  ;;  %v291_v47 = vadd.f32 %v287_v45, %v282_v44  ;;  %v299_v48 = vmul.f32 %v287_v45, %v287_v45  ;;  %v284_v49 = vpop.f32.mrb[1].mxu0  ;;  %v289_v50 = vpop.f32.mrb[1].mxu1 }
 0x162   : > { %v292_v51 = vrot.slane %v291_v47, 4  ;;  %v300_v52 = vadd.f32 %v299_v48, %v298_v46 }
 0x164   : > { %v293_v53 = vadd.f32 %v292_v51, %v291_v47  ;;  %v301_v54 = vrot.slane %v300_v52, 4 }
 0x166   : > { %v294_v55 = vrot.slane %v293_v53, 2  ;;  %v302_v56 = vadd.f32 %v301_v54, %v300_v52 }
 0x168   : > { %v295_v57 = vadd.f32 %v294_v55, %v293_v53  ;;  %v303_v58 = vrot.slane %v302_v56, 2 }
 0x16a   : > { %v296_v59 = vrot.slane %v295_v57, 1  ;;  %v304_v60 = vadd.f32 %v303_v58, %v302_v56 }
 0x16c   : > { %v305_v61 = vrot.slane %v304_v60, 1  ;;  %v297_v62 = vadd.f32 %v296_v59, %v295_v57 }
 0x16e   : > { %v306_v63 = vadd.f32 %v305_v61, %v304_v60 }
 0x170   : > { %v308_v0 = vsel %vm307_vm1, %v297_v62, %v306_v63 }
 0x171   : > { %309 = vst [vmem:[%s177_s27] sm:$0x3] %v308_v0 }
 0x172   : > { %622 = shalt.err (!%p619_p7)
}
 0x173   : > { %s623_s24 = scalar_lea.hbm %s892_s4, 32  ;;  %s627_s26 = scalar_lea.hbm %s938_s2, 64 }
 0x174   : > { %p624_p9 = scmp.ne.s32.totalorder %s892_s4, %s623_s24  ;;  %p628_p5 = scmp.lt.u32.totalorder %s892_s4, %s938_s2 }
 0x175   : > { %p629_p11 = scmp.lt.u32.totalorder %s627_s26, %s623_s24  ;;  %p631_p4 = scmp.lt.u32.totalorder %s623_s24, %s892_s4 }
 0x176   : > { %p625_p2 = pnand %p624_p9, %p795_p12 }
 0x177   : > { %p630_p1 = por %p629_p11, %p628_p5 }
 0x178   : > { %p626_p0 = pneg %p625_p2 }
 0x179   : > { %p632_p6 = por %p631_p4, %p630_p1 }
 0x17b   : > { %p633_p8 = pnand %p632_p6, %p626_p0 }
 0x17d   : > { %636 = shalt.err (!%p633_p8)
}
 0x17e   : > { %495 = dma.vmem_to_hbm [thread:$0]  (%p795_p12), %s894_s22, 32, %s892_s4, %s311_s5  }
 0x17f PF: > { %s336_s30 = sand.u32 1, %s667_s9   ;;  %p953_p10 = scmp.ne.s32.totalorder %s943_s16, 0 }
 0x180   : > { %p954_p13 = scmp.ge.s32.totalorder %s679_s12, 2  ;;  %s337_s3 = scalar_lea.sflag [#allocation4], %s336_s30 }
 0x182   : > { %p506_p3 = pnand %p954_p13, %p953_p10 }
 0x184   : > { %662 = dma.done.wait (!%p506_p3), %s337_s3, 32  }
 0x185   : > { %664 = vsyncadd (!%p506_p3), %s337_s3, 4294967264  ;;  %p16_p7 = scmp.ge.s32.totalorder %s760_s21, 4   ;;  %s955_s9 = smov %s671_s10 }
 0x186   : > { %s956_s10 = smov %s675_s11  ;;  %s957_s11 = smov %s791_s8 }
 0x187   : > { %s958_s12 = smov %s760_s21  ;;  %18 = sbr.rel (!%p16_p7) target bundleno = 6 (0x6), region = 77 }
 0x18e   :  { %342 = vsyncpa [#allocation3], 1 }
 0x18f   :  { %344 = vsyncpa [#allocation3 + $0x1], 1 }
 0x190   :  { %345 = vsyncpa [#allocation6], 1 }
 0x191   :  { %346 = vsyncpa [#allocation4], 1 }
 0x192   :  { %348 = vsyncpa [#allocation4 + $0x1], 1 }

</bundles_post_ra>
